<compile_context>
chip_gen: v7x
topology: tpu7x:2x2x1
jax: 0.10.0
libtpu: 0.0.40
codegen_flags: <defaults>
</compile_context>

<pallas_src>
import functools

import jax
import jax.numpy as jnp
from jax.experimental import pallas as pl
from jax.experimental.pallas import tpu as pltpu

_LANES = 128
_TARGET_BLOCK_BYTES = 4 << 20      # ~4 MiB per input per grid step
_VMEM_HEADROOM_BYTES = 8 << 20     # headroom on top of the 4x double-buffered blocks
_NUM_SLICES = 2                    # leading "parallel" axis (2 TensorCores on v7x)


def _mse_partial_kernel(x_ref, t_ref, o_ref, *, n_chunks, block_chunks):
    s = pl.program_id(0)               # parallel slice
    i = pl.program_id(1)               # sequential step within the slice
    inner_steps = pl.num_programs(1)

    @pl.when(i == 0)
    def _():
        o_ref[...] = jnp.zeros_like(o_ref)

    chunk_start = (s * inner_steps + i) * block_chunks
    d = x_ref[...].astype(jnp.float32) - t_ref[...].astype(jnp.float32)
    sq = d * d

    # Fast path: block fully inside the logical array -> plain VPU fold,
    # no per-element mask work in steady state.
    is_full = chunk_start + block_chunks <= n_chunks

    @pl.when(is_full)
    def _():
        o_ref[...] += jnp.sum(sq, axis=0)

    # Slow path: boundary block (partial) or clamped grid cell -> mask chunks
    # past the logical end (their VMEM contents are unspecified, must be zeroed).
    @pl.when(jnp.logical_not(is_full))
    def _():
        local_chunk = jax.lax.broadcasted_iota(jnp.int32, sq.shape, 0)
        masked = jnp.where(chunk_start + local_chunk < n_chunks, sq, 0.0)
        o_ref[...] += jnp.sum(masked, axis=0)


def mse_loss(inputs, targets):
    """Pallas implementation of torch.mean((inputs - targets)**2)."""
    assert inputs.shape == targets.shape
    n_true = inputs.size

    out_dtype = jnp.promote_types(inputs.dtype, targets.dtype)
    if not jnp.issubdtype(out_dtype, jnp.floating):
        out_dtype = jnp.float32

    x = jnp.ravel(inputs)
    t = jnp.ravel(targets)
    # TPU has no efficient 64-bit path; stream wide dtypes as f32.
    if x.dtype.itemsize > 4:
        x = x.astype(jnp.float32)
    if t.dtype.itemsize > 4:
        t = t.astype(jnp.float32)

    # Packed-tile sublane count: 8 for 32-bit, 16 for 16-bit, 32 for 8-bit,
    # keyed off the widest operand so both arrays share the same chunking.
    itemsize = max(x.dtype.itemsize, t.dtype.itemsize)
    sublanes = 8 * (4 // itemsize)
    chunk = sublanes * _LANES               # elements per chunk
    chunk_bytes = chunk * itemsize          # 4 KiB for itemsize in {1, 2, 4}

    n_chunks = n_true // chunk
    n_main = n_chunks * chunk

    # Ragged tail (< chunk elements): tiny plain-JAX sum, no full-array pad/copy.
    if n_main < n_true:
        tail_sse = jnp.sum(
            (x[n_main:].astype(jnp.float32) - t[n_main:].astype(jnp.float32)) ** 2
        )
    else:
        tail_sse = jnp.float32(0.0)

    if n_chunks == 0:
        return (tail_sse / jnp.float32(n_true)).astype(out_dtype)

    # Aligned case: identity views (no copy). Ragged case: only the aligned
    # prefix is streamed through the kernel.
    xm = x if n_main == n_true else x[:n_main]
    tm_ = t if n_main == n_true else t[:n_main]
    x3 = xm.reshape(n_chunks, sublanes, _LANES)
    t3 = tm_.reshape(n_chunks, sublanes, _LANES)

    # Generation-aware block sizing: keep 2 inputs x 2 buffers well inside
    # physical VMEM (v5e/v6e: 128 MiB, v7x: 64 MiB per TC).
    block_bytes = _TARGET_BLOCK_BYTES
    try:
        vmem_bytes = getattr(pltpu.get_tpu_info(), "vmem_capacity_bytes", None)
        if vmem_bytes:
            block_bytes = min(block_bytes, max(1 << 20, vmem_bytes // 16))
    except Exception:
        pass
    block_chunks = max(1, min(block_bytes // chunk_bytes, n_chunks))

    nb = pl.cdiv(n_chunks, block_chunks)          # number of real blocks
    num_slices = _NUM_SLICES if nb >= _NUM_SLICES else 1
    inner_steps = pl.cdiv(nb, num_slices)         # blocks per parallel slice

    def in_map(s, i):
        # At most (num_slices*inner_steps - nb) < num_slices trailing cells are
        # clamped onto the last real block; their contribution is masked to 0.
        return (jnp.minimum(s * inner_steps + i, nb - 1), 0, 0)

    out_rows = num_slices * sublanes
    bytes_accessed = n_main * (x.dtype.itemsize + t.dtype.itemsize) + out_rows * _LANES * 4

    partials = pl.pallas_call(
        functools.partial(
            _mse_partial_kernel, n_chunks=n_chunks, block_chunks=block_chunks
        ),
        out_shape=jax.ShapeDtypeStruct((out_rows, _LANES), jnp.float32),
        grid_spec=pltpu.PrefetchScalarGridSpec(
            num_scalar_prefetch=0,
            grid=(num_slices, inner_steps),
            in_specs=[
                pl.BlockSpec((block_chunks, sublanes, _LANES), in_map),
                pl.BlockSpec((block_chunks, sublanes, _LANES), in_map),
            ],
            out_specs=pl.BlockSpec((sublanes, _LANES), lambda s, i: (s, 0)),
        ),
        compiler_params=pltpu.CompilerParams(
            dimension_semantics=("parallel", "arbitrary"),
            vmem_limit_bytes=4 * block_chunks * chunk_bytes + _VMEM_HEADROOM_BYTES,
        ),
        cost_estimate=pl.CostEstimate(
            flops=3 * n_main,
            transcendentals=0,
            bytes_accessed=bytes_accessed,
        ),
    )(x3, t3)

    # Tiny final reduction + divide in plain JAX.
    loss = (jnp.sum(partials, dtype=jnp.float32) + tail_sse) / jnp.float32(n_true)
    return loss.astype(out_dtype)


if __name__ == "__main__":
    key = jax.random.PRNGKey(0)
    k1, k2 = jax.random.split(key)

    # Small NCHW-like shapes consistent with a typical loss call.
    shape = (2, 4, 16, 16)
    inputs = jax.random.normal(k1, shape, dtype=jnp.float32)
    targets = jax.random.normal(k2, shape, dtype=jnp.float32)

    loss = jax.block_until_ready(mse_loss(inputs, targets))

    # Reference check (same semantics as torch.mean((a - b) ** 2)).
    ref = jnp.mean((inputs - targets) ** 2)
    assert jnp.allclose(loss, ref, rtol=1e-6, atol=1e-6), (loss, ref)

    print("KERNEL_OK")
</pallas_src>

<mosaic_0001>
module attributes {stable_mosaic.version = 11 : i64} {
  func.func @_mse_partial_kernel(%arg0: i32, %arg1: i32, %arg2: memref<2x8x128xf32, #tpu.memory_space<vmem>>, %arg3: memref<2x8x128xf32, #tpu.memory_space<vmem>>, %arg4: memref<8x128xf32, #tpu.memory_space<vmem>>) attributes {dimension_semantics = [#tpu.dimension_semantics<parallel>, #tpu.dimension_semantics<arbitrary>], iteration_bounds = array<i64: 1, 1>, scalar_prefetch = 0 : i64, scratch_operands = 0 : i64, tpu.core_type = #tpu.core_type<tc>, window_params = [{transform_indices = @transform_0, window_bounds = array<i64: 2, 8, 128>}, {transform_indices = @transform_1, window_bounds = array<i64: 2, 8, 128>}, {transform_indices = @transform_2, window_bounds = array<i64: 8, 128>}]} {
    %c0_i32 = arith.constant 0 : i32
    %0 = arith.cmpi eq, %arg1, %c0_i32 : i32
    %1 = arith.extui %0 : i1 to i32
    %c0_i32_0 = arith.constant 0 : i32
    %2 = arith.cmpi ne, %1, %c0_i32_0 : i32
    scf.if %2 {
      %cst = arith.constant 0.000000e+00 : f32
      %17 = vector.broadcast %cst : f32 to vector<8x128xf32>
      %c0_10 = arith.constant 0 : index
      %c0_11 = arith.constant 0 : index
      %18 = vector.load %arg4[%c0_10, %c0_11] : memref<8x128xf32, #tpu.memory_space<vmem>>, vector<8x128xf32>
      tpu.vector_store %arg4[%c0_10, %c0_11], %17 {strides = array<i32>} : memref<8x128xf32, #tpu.memory_space<vmem>>, vector<8x128xf32>,
    } else {
    }
    %c1_i32 = arith.constant 1 : i32
    %3 = arith.muli %arg0, %c1_i32 : i32
    %4 = arith.addi %3, %arg1 : i32
    %c2_i32 = arith.constant 2 : i32
    %5 = arith.muli %4, %c2_i32 : i32
    %c0 = arith.constant 0 : index
    %c0_1 = arith.constant 0 : index
    %c0_2 = arith.constant 0 : index
    %6 = vector.load %arg2[%c0, %c0_1, %c0_2] : memref<2x8x128xf32, #tpu.memory_space<vmem>>, vector<2x8x128xf32>
    %c0_3 = arith.constant 0 : index
    %c0_4 = arith.constant 0 : index
    %c0_5 = arith.constant 0 : index
    %7 = vector.load %arg3[%c0_3, %c0_4, %c0_5] : memref<2x8x128xf32, #tpu.memory_space<vmem>>, vector<2x8x128xf32>
    %8 = arith.subf %6, %7 : vector<2x8x128xf32>
    %9 = arith.mulf %8, %8 : vector<2x8x128xf32>
    %c2_i32_6 = arith.constant 2 : i32
    %10 = arith.addi %5, %c2_i32_6 : i32
    %c2_i32_7 = arith.constant 2 : i32
    %11 = arith.cmpi sle, %10, %c2_i32_7 : i32
    %12 = arith.extui %11 : i1 to i32
    %c0_i32_8 = arith.constant 0 : i32
    %13 = arith.cmpi ne, %12, %c0_i32_8 : i32
    scf.if %13 {
      %c0_10 = arith.constant 0 : index
      %c0_11 = arith.constant 0 : index
      %17 = vector.load %arg4[%c0_10, %c0_11] : memref<8x128xf32, #tpu.memory_space<vmem>>, vector<8x128xf32>
      %cst = arith.constant dense<0.000000e+00> : vector<8x128xf32>
      %18 = vector.multi_reduction <add>, %9, %cst [0] : vector<2x8x128xf32> to vector<8x128xf32>
      %19 = arith.addf %17, %18 : vector<8x128xf32>
      %c0_12 = arith.constant 0 : index
      %c0_13 = arith.constant 0 : index
      %20 = vector.load %arg4[%c0_12, %c0_13] : memref<8x128xf32, #tpu.memory_space<vmem>>, vector<8x128xf32>
      tpu.vector_store %arg4[%c0_12, %c0_13], %19 {strides = array<i32>} : memref<8x128xf32, #tpu.memory_space<vmem>>, vector<8x128xf32>,
    } else {
    }
    %true = arith.constant true
    %14 = arith.xori %11, %true : i1
    %15 = arith.extui %14 : i1 to i32
    %c0_i32_9 = arith.constant 0 : i32
    %16 = arith.cmpi ne, %15, %c0_i32_9 : i32
    scf.if %16 {
      %17 = tpu.iota {dimensions = array<i32: 0>} : vector<2x8x128xi32>
      %18 = vector.broadcast %5 : i32 to vector<2x8x128xi32>
      %19 = arith.addi %18, %17 : vector<2x8x128xi32>
      %c2_i32_10 = arith.constant 2 : i32
      %20 = vector.broadcast %c2_i32_10 : i32 to vector<2x8x128xi32>
      %21 = arith.cmpi slt, %19, %20 : vector<2x8x128xi32>
      %cst = arith.constant 0.000000e+00 : f32
      %22 = vector.broadcast %cst : f32 to vector<2x8x128xf32>
      %23 = arith.select %21, %9, %22 : vector<2x8x128xi1>, vector<2x8x128xf32>
      %c0_11 = arith.constant 0 : index
      %c0_12 = arith.constant 0 : index
      %24 = vector.load %arg4[%c0_11, %c0_12] : memref<8x128xf32, #tpu.memory_space<vmem>>, vector<8x128xf32>
      %cst_13 = arith.constant dense<0.000000e+00> : vector<8x128xf32>
      %25 = vector.multi_reduction <add>, %23, %cst_13 [0] : vector<2x8x128xf32> to vector<8x128xf32>
      %26 = arith.addf %24, %25 : vector<8x128xf32>
      %c0_14 = arith.constant 0 : index
      %c0_15 = arith.constant 0 : index
      %27 = vector.load %arg4[%c0_14, %c0_15] : memref<8x128xf32, #tpu.memory_space<vmem>>, vector<8x128xf32>
      tpu.vector_store %arg4[%c0_14, %c0_15], %26 {strides = array<i32>} : memref<8x128xf32, #tpu.memory_space<vmem>>, vector<8x128xf32>,
    } else {
    }
    return
  }
  func.func @transform_0(%arg0: i32, %arg1: i32) -> (i32, i32, i32) {
    %c1_i32 = arith.constant 1 : i32
    %0 = arith.muli %arg0, %c1_i32 : i32
    %1 = arith.addi %0, %arg1 : i32
    %c0_i32 = arith.constant 0 : i32
    %2 = arith.minsi %1, %c0_i32 : i32
    %c0_i32_0 = arith.constant 0 : i32
    %c0_i32_1 = arith.constant 0 : i32
    %c0_i32_2 = arith.constant 0 : i32
    return %2, %c0_i32_0, %c0_i32_1 : i32, i32, i32
  }
  func.func @transform_1(%arg0: i32, %arg1: i32) -> (i32, i32, i32) {
    %c1_i32 = arith.constant 1 : i32
    %0 = arith.muli %arg0, %c1_i32 : i32
    %1 = arith.addi %0, %arg1 : i32
    %c0_i32 = arith.constant 0 : i32
    %2 = arith.minsi %1, %c0_i32 : i32
    %c0_i32_0 = arith.constant 0 : i32
    %c0_i32_1 = arith.constant 0 : i32
    %c0_i32_2 = arith.constant 0 : i32
    return %2, %c0_i32_0, %c0_i32_1 : i32, i32, i32
  }
  func.func @transform_2(%arg0: i32, %arg1: i32) -> (i32, i32) {
    %c0_i32 = arith.constant 0 : i32
    %c0_i32_0 = arith.constant 0 : i32
    return %arg0, %c0_i32 : i32, i32
  }
}

</mosaic_0001>

<bundles_post_ra>
// kernel: tpu_custom_call.1
= control target key start
LH: loop header
LB: loop body
LE: loop exit
PB: predicated region body
PF: predicated region fallthrough
CT: control target
= control target key end

     0   :  { %7 = vsyncpa [#allocation3], 0  ;;  %s252_s0 = inlined_call_operand.hbm [shape: f32[2,8,128], index: 0, kind: input, shape index: {}]   ;;  %s253_s1 = inlined_call_operand.hbm [shape: f32[2,8,128], index: 1, kind: input, shape index: {}]   ;;  %s254_s2 = inlined_call_operand.hbm [shape: f32[8,128], index: 2, kind: output, shape index: {}]  }
   0x1   :  { %8 = vsyncpa [#allocation6], 0 }
   0x2   :  { %9 = vsyncpa [#allocation4], 0  ;;  %s196_s9 = smov [#allocation2]   ;;  %s124_s13 = scalar_lea.hbm %s252_s0, 256 }
   0x3   :  { %s21_s10 = sshll.u32 %s196_s9, 4  ;;  %p125_p0 = scmp.ne.s32.totalorder %s252_s0, %s124_s13  ;;  %s22_s10 = int_to_ptr.vmem [resolvable:$true] %s21_s10 }
   0x4   :  { %p128_p1 = scmp.lt.u32.totalorder %s124_s13, %s252_s0 }
   0x6   :  { %p130_p2 = pnand %p128_p1, %p125_p0 }
   0x8   :  { %133 = shalt.err (!%p130_p2)
}
   0x9   :  { %s134_s18 = scalar_lea.vmem %s22_s10, 256  ;;  %p139_p4 = scmp.lt.s32.totalorder %s22_s10, %s22_s10 }
   0xa   :  { %p135_p3 = scmp.ne.s32.totalorder %s22_s10, %s134_s18  ;;  %p140_p5 = scmp.lt.s32.totalorder %s134_s18, %s134_s18 }
   0xc   :  { %p141_p6 = por %p140_p5, %p139_p4 }
   0xe   :  { %p142_p7 = pnand %p141_p6, %p135_p3 }
  0x10   :  { %145 = shalt.err (!%p142_p7)
}
  0x11   :  { %s197_s19 = smov 128   ;;  %s198_s20 = smov 8  }
  0x12   :  { %27 = dma.hbm_to_vmem [thread:$0]  %s252_s0, 256, %s22_s10, [#allocation3], %s197_s19, %s197_s19, %s198_s20  }
  0x13   :  { %s199_s23 = smov [#allocation5]   ;;  %s146_s27 = scalar_lea.hbm %s253_s1, 256 }
  0x14   :  { %s39_s24 = sshll.u32 %s199_s23, 4  ;;  %p147_p8 = scmp.ne.s32.totalorder %s253_s1, %s146_s27  ;;  %s40_s24 = int_to_ptr.vmem [resolvable:$true] %s39_s24 }
  0x15   :  { %p150_p9 = scmp.lt.u32.totalorder %s146_s27, %s253_s1 }
  0x17   :  { %p152_p10 = pnand %p150_p9, %p147_p8 }
  0x19   :  { %155 = shalt.err (!%p152_p10)
}
  0x1a   :  { %s156_s4 = scalar_lea.vmem %s40_s24, 256  ;;  %p161_p12 = scmp.lt.s32.totalorder %s40_s24, %s40_s24 }
  0x1b   :  { %p157_p11 = scmp.ne.s32.totalorder %s40_s24, %s156_s4  ;;  %p162_p13 = scmp.lt.s32.totalorder %s156_s4, %s156_s4 }
  0x1d   :  { %p163_p0 = por %p162_p13, %p161_p12 }
  0x1f   :  { %p164_p1 = pnand %p163_p0, %p157_p11 }
  0x21   :  { %167 = shalt.err (!%p164_p1)
}
  0x22   :  { %45 = dma.hbm_to_vmem [thread:$0]  %s253_s1, 256, %s40_s24, [#allocation6], %s197_s19, %s197_s19, %s198_s20  }
  0x23   :  { %190 = dma.done.wait [#allocation3], 256  }
  0x24   :  { %191 = vsyncadd [#allocation3], 4294967040 }
  0x25   :  { %192 = dma.done.wait [#allocation6], 256  }
  0x26   :  { %193 = vsyncadd [#allocation6], 4294967040  ;;  %v67_v0 = vld [vmem:[#allocation2] sm:$0xff]  ;;  %v68_v1 = vld [vmem:[#allocation2 + $0x8] sm:$0xff]  ;;  %s200_s6 = smov [#allocation7]  }
  0x27   :  { %v69_v2 = vld [vmem:[#allocation5] sm:$0xff]  ;;  %v70_v3 = vld [vmem:[#allocation5 + $0x8] sm:$0xff]  ;;  %s104_s7 = sshll.u32 %s200_s6, 4  ;;  %s105_s7 = int_to_ptr.vmem [resolvable:$true] %s104_s7 }
  0x28   :  { %v71_v4 = vsub.f32 %v67_v0, %v69_v2  ;;  %v72_v5 = vsub.f32 %v68_v1, %v70_v3  ;;  %s168_s8 = scalar_lea.vmem %s105_s7, 128  ;;  %p173_p3 = scmp.lt.s32.totalorder %s105_s7, %s105_s7 }
  0x29   :  { %p169_p2 = scmp.ne.s32.totalorder %s105_s7, %s168_s8  ;;  %p174_p4 = scmp.lt.s32.totalorder %s168_s8, %s168_s8 }
  0x2a   :  { %v73_v6 = vmul.f32 %v71_v4, %v71_v4  ;;  %v74_v7 = vmul.f32 %v72_v5, %v72_v5 }
  0x2b   :  { %p175_p5 = por %p174_p4, %p173_p3 }
  0x2c   :  { %v81_v8 = vadd.f32 %v74_v7, %v73_v6 }
  0x2d   :  { %p176_p6 = pnand %p175_p5, %p169_p2 }
  0x2e   :  { %83 = vst [vmem:[#allocation7] sm:$0xff] %v81_v8 }
  0x2f   :  { %179 = shalt.err (!%p176_p6)
}
  0x30   :  { %s180_s10 = scalar_lea.hbm %s254_s2, 128 }
  0x31   :  { %p181_p7 = scmp.ne.s32.totalorder %s254_s2, %s180_s10  ;;  %p184_p8 = scmp.lt.u32.totalorder %s180_s10, %s254_s2 }
  0x33   :  { %p186_p9 = pnand %p184_p8, %p181_p7 }
  0x35   :  { %189 = shalt.err (!%p186_p9)
}
  0x36   :  { %107 = dma.vmem_to_hbm [thread:$0]  %s105_s7, 128, %s254_s2, [#allocation4]  }
  0x37   :  { %194 = dma.done.wait [#allocation4], 128  }
  0x38   :  { %195 = vsyncadd [#allocation4], 4294967168 }
  0x39   :  { %111 = vsyncpa [#allocation3], 1 }
  0x3a   :  { %112 = vsyncpa [#allocation6], 1 }
  0x3b   :  { %113 = vsyncpa [#allocation4], 1 }

</bundles_post_ra>
